<compile_context>
chip_gen: v6e
topology: v6e:2x2x1
jax: 0.10.0
libtpu: 0.0.40
codegen_flags: <defaults>
</compile_context>

<pallas_src>
import jax
import jax.numpy as jnp
from jax.experimental import pallas as pl
from jax.experimental.pallas import tpu as pltpu


def _chomp_prefix_copy_kernel(x_ref, o_ref):
    # x_ref: (row_tile, D*H*W), o_ref: (row_tile, D_out*H*W).
    out_w = o_ref.shape[-1]
    o_ref[...] = x_ref[:, :out_w]


def _choose_row_tile(num_rows: int, row_in_bytes: int,
                     target_bytes: int = 2 << 20) -> int:
    """Rows per grid step: ~target_bytes of input per block, sublane-aligned."""
    tile = max(1, target_bytes // max(1, row_in_bytes))
    if num_rows >= 16:
        # Keep >=2 grid steps so v7x (2 TensorCores/chip) can shard the
        # parallel row axis; on v5e/v6e (1 TC) this is a measured no-op.
        tile = min(tile, -(-num_rows // 2))
    if tile >= num_rows:
        return num_rows
    # Second-minor block dim: keep it a multiple of 8 (sublane tile) unless it
    # covers the full row extent.
    tile = max(8, (tile // 8) * 8)
    return min(tile, num_rows)


def chomp3d(x: jax.Array, chomp_size) -> jax.Array:
    """Equivalent of Chomp3d(chomp_size).forward(x) for x in NCDHW layout."""
    chomp = int(chomp_size[0])
    N, C, D, H, W = x.shape
    if chomp == 0:
        # Nothing to drop; input is already the desired contiguous array.
        return x
    assert 0 < chomp < D, "chomp must remove a strict, non-empty suffix of D"
    D_out = D - chomp

    NC = N * C
    HW = H * W
    in_w = D * HW          # full (flattened) row length
    out_w = D_out * HW     # retained prefix length

    itemsize = x.dtype.itemsize
    x2 = x.reshape(NC, in_w)  # free: data is already contiguous in this order

    row_tile = _choose_row_tile(NC, in_w * itemsize)
    grid = (pl.cdiv(NC, row_tile),)

    # Input block: full row (minor dim == full extent -> unmasked wide loads).
    # Output block: full retained width (full extent of the output minor dim).
    in_spec = pl.BlockSpec((row_tile, in_w), lambda i: (i, 0))
    out_spec = pl.BlockSpec((row_tile, out_w), lambda i: (i, 0))

    bytes_accessed = (NC * in_w + NC * out_w) * itemsize
    y2 = pl.pallas_call(
        _chomp_prefix_copy_kernel,
        out_shape=jax.ShapeDtypeStruct((NC, out_w), x.dtype),
        grid=grid,
        in_specs=[in_spec],
        out_specs=out_spec,
        compiler_params=pltpu.CompilerParams(
            dimension_semantics=("parallel",),
            vmem_limit_bytes=32 * 1024 * 1024,
        ),
        cost_estimate=pl.CostEstimate(
            flops=0, transcendentals=0, bytes_accessed=bytes_accessed),
    )(x2)

    return y2.reshape(N, C, D_out, H, W)


if __name__ == "__main__":
    key = jax.random.PRNGKey(0)
    # Small NCDHW input consistent with a 3D-conv activation:
    # batch=2, channels=4, depth/time=8, H=5, W=6; chomp 3 along depth.
    N, C, D, H, W = 2, 4, 8, 5, 6
    chomp_size = (3,)

    x = jax.random.normal(key, (N, C, D, H, W), dtype=jnp.float32)

    y = chomp3d(x, chomp_size)
    y = jax.block_until_ready(y)

    # Reference: plain-JAX slice (same semantics as the PyTorch module).
    ref = x[:, :, : D - chomp_size[0], :, :]
    assert y.shape == (N, C, D - chomp_size[0], H, W)
    assert y.dtype == x.dtype
    assert bool(jnp.array_equal(y, ref))

    print("KERNEL_OK")
</pallas_src>

<mosaic_0001>
module attributes {stable_mosaic.version = 11 : i64} {
  func.func @_chomp_prefix_copy_kernel(%arg0: i32, %arg1: memref<8x240xf32, #tpu.memory_space<vmem>>, %arg2: memref<8x150xf32, #tpu.memory_space<vmem>>) attributes {dimension_semantics = [#tpu.dimension_semantics<parallel>], iteration_bounds = array<i64: 1>, scalar_prefetch = 0 : i64, scratch_operands = 0 : i64, tpu.core_type = #tpu.core_type<tc>, window_params = [{transform_indices = @transform_0, window_bounds = array<i64: 8, 240>}, {transform_indices = @transform_1, window_bounds = array<i64: 8, 150>}]} {
    %c0 = arith.constant 0 : index
    %c0_0 = arith.constant 0 : index
    %0 = vector.load %arg1[%c0, %c0_0] : memref<8x240xf32, #tpu.memory_space<vmem>>, vector<8x150xf32>
    %c0_1 = arith.constant 0 : index
    %c0_2 = arith.constant 0 : index
    %1 = vector.load %arg2[%c0_1, %c0_2] : memref<8x150xf32, #tpu.memory_space<vmem>>, vector<8x150xf32>
    tpu.vector_store %arg2[%c0_1, %c0_2], %0 {strides = array<i32>} : memref<8x150xf32, #tpu.memory_space<vmem>>, vector<8x150xf32>,
    return
  }
  func.func @transform_0(%arg0: i32) -> (i32, i32) {
    %c0_i32 = arith.constant 0 : i32
    %c0_i32_0 = arith.constant 0 : i32
    return %arg0, %c0_i32 : i32, i32
  }
  func.func @transform_1(%arg0: i32) -> (i32, i32) {
    %c0_i32 = arith.constant 0 : i32
    %c0_i32_0 = arith.constant 0 : i32
    return %arg0, %c0_i32 : i32, i32
  }
}

</mosaic_0001>

<bundles_post_ra>
// kernel: tpu_custom_call.1
= control target key start
LH: loop header
LB: loop body
LE: loop exit
PB: predicated region body
PF: predicated region fallthrough
CT: control target
= control target key end

     0   :  { %6 = vsyncpa [#allocation3], 0  ;;  %s105_s0 = inlined_call_operand.hbm [shape: f32[8,240], index: 0, kind: input, shape index: {}]   ;;  %s106_s1 = inlined_call_operand.hbm [shape: f32[8,150], index: 1, kind: output, shape index: {}]  }
   0x1   :  { %7 = vsyncpa [#allocation4], 0  ;;  %s87_s6 = smov [#allocation2]  }
   0x2   :  { %s14_s7 = sshll.u32 %s87_s6, 4  ;;  %s15_s7 = int_to_ptr.vmem [resolvable:$true] %s14_s7 }
   0x3   :  { %s51_s8 = scalar_lea.vmem %s15_s7, 256  ;;  %p56_p1 = scmp.lt.s32.totalorder %s15_s7, %s15_s7 }
   0x4   :  { %p52_p0 = scmp.ne.s32.totalorder %s15_s7, %s51_s8  ;;  %p57_p2 = scmp.lt.s32.totalorder %s51_s8, %s51_s8 }
   0x6   :  { %p58_p3 = por %p57_p2, %p56_p1 }
   0x8   :  { %p59_p4 = pnand %p58_p3, %p52_p0 }
   0xa   :  { %62 = shalt.err (!%p59_p4)
}
   0xb   :  { %17 = dma.hbm_to_vmem [thread:$0]  %s105_s0, 256, %s15_s7, [#allocation3]  }
   0xc   :  { %83 = dma.done.wait [#allocation3], 256  }
   0xd   :  { %84 = vsyncadd [#allocation3], 4294967040  ;;  %s88_s11 = smov [#allocation5]   ;;  %vm24_vm0 = vcmask 179200   ;;  %v21_v0 = vld [vmem:[#allocation2] sm:$0xff]  ;;  %v22_v1 = vld [vmem:[#allocation2 + $0x8] sm:$0xff] }
   0xe   :  { %s32_s12 = sshll.u32 %s88_s11, 4  ;;  %23 = vst [vmem:[#allocation5] sm:$0xff] %v21_v0  ;;  %25 = vst.msk [vmem:[#allocation5 + $0x8] sm:$0xff] %vm24_vm0, %v22_v1  ;;  %s33_s12 = int_to_ptr.vmem [resolvable:$true] %s32_s12 }
   0xf   :  { %s63_s13 = scalar_lea.vmem %s33_s12, 256  ;;  %p68_p6 = scmp.lt.s32.totalorder %s33_s12, %s33_s12 }
  0x10   :  { %p64_p5 = scmp.ne.s32.totalorder %s33_s12, %s63_s13  ;;  %p69_p7 = scmp.lt.s32.totalorder %s63_s13, %s63_s13 }
  0x12   :  { %p70_p8 = por %p69_p7, %p68_p6 }
  0x14   :  { %p71_p9 = pnand %p70_p8, %p64_p5 }
  0x16   :  { %74 = shalt.err (!%p71_p9)
}
  0x17   :  { %35 = dma.vmem_to_hbm [thread:$0]  %s33_s12, 256, %s106_s1, [#allocation4]  }
  0x18   :  { %85 = dma.done.wait [#allocation4], 256  }
  0x19   :  { %86 = vsyncadd [#allocation4], 4294967040 }
  0x1a   :  { %39 = vsyncpa [#allocation3], 1 }
  0x1b   :  { %40 = vsyncpa [#allocation4], 1 }

</bundles_post_ra>
